<compile_context>
chip_gen: v6e
topology: v6e:2x2x1
jax: 0.10.0
libtpu: 0.0.40
codegen_flags: <defaults>
</compile_context>

<pallas_src>
import jax
import jax.numpy as jnp
from jax.experimental import pallas as pl
from jax.experimental.pallas import tpu as pltpu

LANES = 128      # vreg lane width
SUBLANES = 8     # f32 sublanes per vreg


def _round_up(a, b):
    return (a + b - 1) // b * b


def _cdiv(a, b):
    return (a + b - 1) // b


def _lorenz63_kernel(params_ref, state_ref, out_ref):
    # params_ref: SMEM (3,)          -> [sigma, rho, beta]
    # state_ref : VMEM (3, tm, 128)  -> lane-dense component slabs
    # out_ref   : VMEM (3, tm, 128)
    sigma = params_ref[0]
    rho = params_ref[1]
    beta = params_ref[2]

    x = state_ref[0]   # (tm, 128) full vregs, unmasked loads/stores
    y = state_ref[1]
    z = state_ref[2]

    out_ref[0] = sigma * (y - x)
    out_ref[1] = x * (rho - z) - y
    out_ref[2] = x * y - beta * z


def lorenz63_forward(t, state, sigma, rho, beta, *, block_rows=2048):
    """Pallas equivalent of Lorenz63.forward(t, state).

    state: (3, N) float32.  Returns (3, N) float32 = stack([dx, dy, dz]).
    `t` is accepted but unused, exactly like the PyTorch module.
    """
    del t  # unused by the dynamics, same as the reference module

    state = jnp.asarray(state, jnp.float32)
    c, n = state.shape
    assert c == 3, "state must have shape (3, N)"

    params = jnp.stack(
        [jnp.asarray(sigma, jnp.float32),
         jnp.asarray(rho, jnp.float32),
         jnp.asarray(beta, jnp.float32)]
    )

    # ---- lane-dense layout: (3, N) -> (3, m, 128) with m = ceil(N / 128).
    m = _cdiv(n, LANES)

    # Row tile: multiple of 8 (capped by block_rows); for larger inputs cap at
    # ~ceil(m/2) so the grid has >= 2 programs (v7x megacore sharding).
    br = max(SUBLANES, _round_up(block_rows, SUBLANES))
    if m >= 2 * SUBLANES:
        br = min(br, _round_up(_cdiv(m, 2), SUBLANES))
    # Either the tile equals the full M extent (single block, any size allowed)
    # or it is a multiple of 8 and the partial last block is masked by Pallas.
    tm = m if m <= br else br
    grid = (_cdiv(m, tm),)

    pad = m * LANES - n
    x = state
    if pad:
        # TODO(synk): for N % 128 != 0 this pad (and the final slice) each
        # re-materialize the (3, N) array; if ragged N matters in production,
        # handle the tail in-kernel (manual DMA + masked store) instead.
        x = jnp.pad(state, ((0, 0), (0, pad)))
    # Row-major split of the last dim: free bitcast, no data movement.
    x = x.reshape(c, m, LANES)

    out_r = pl.pallas_call(
        _lorenz63_kernel,
        out_shape=jax.ShapeDtypeStruct((c, m, LANES), jnp.float32),
        grid=grid,
        in_specs=[
            pl.BlockSpec(memory_space=pltpu.SMEM),              # params (3,)
            pl.BlockSpec((c, tm, LANES), lambda i: (0, i, 0)),  # state tile
        ],
        out_specs=pl.BlockSpec((c, tm, LANES), lambda i: (0, i, 0)),
        compiler_params=pltpu.CompilerParams(
            dimension_semantics=("parallel",),
            vmem_limit_bytes=32 * 1024 * 1024,
        ),
    )(params, x)

    # Undo layout (free reshape); slice only when N was not 128-aligned.
    out = out_r.reshape(c, m * LANES)
    return out if pad == 0 else out[:, :n]


def _reference(t, state, sigma, rho, beta):
    del t
    x, y, z = state
    dx = sigma * (y - x)
    dy = x * (rho - z) - y
    dz = x * y - beta * z
    return jnp.stack([dx, dy, dz])


if __name__ == "__main__":
    # Deterministic "parameters" (module __init__ takes scalar sigma/rho/beta).
    sigma, rho, beta = 10.0, 28.0, 8.0 / 3.0
    sigma_f, rho_f, beta_f = (jnp.float32(sigma), jnp.float32(rho),
                              jnp.float32(beta))

    key = jax.random.PRNGKey(0)
    k1, k2, k3, k4 = jax.random.split(key, 4)
    t = jnp.float32(0.0)

    # Case 1: 128-aligned N -> zero-copy fast path, single block.
    state1 = jax.random.normal(k1, (3, 1024), dtype=jnp.float32)
    out1 = jax.block_until_ready(lorenz63_forward(t, state1, sigma, rho, beta))
    ref1 = _reference(t, state1, sigma_f, rho_f, beta_f)
    assert out1.shape == state1.shape and out1.dtype == jnp.float32
    assert jnp.allclose(out1, ref1, atol=1e-5, rtol=1e-5)

    # Case 2: multi-step pipelined grid (block_rows=8 -> 4 tiles).
    state2 = jax.random.normal(k2, (3, 4096), dtype=jnp.float32)
    out2 = jax.block_until_ready(
        lorenz63_forward(t, state2, sigma, rho, beta, block_rows=8))
    ref2 = _reference(t, state2, sigma_f, rho_f, beta_f)
    assert out2.shape == state2.shape and out2.dtype == jnp.float32
    assert jnp.allclose(out2, ref2, atol=1e-5, rtol=1e-5)

    # Case 3: N not a multiple of 128 (exercises minimal tail padding path).
    state3 = jax.random.normal(k3, (3, 1000), dtype=jnp.float32)
    out3 = jax.block_until_ready(lorenz63_forward(t, state3, sigma, rho, beta))
    ref3 = _reference(t, state3, sigma_f, rho_f, beta_f)
    assert out3.shape == state3.shape and out3.dtype == jnp.float32
    assert jnp.allclose(out3, ref3, atol=1e-5, rtol=1e-5)

    # Case 4: cdiv grid with a masked partial last block (m=20, tm=16).
    state4 = jax.random.normal(k4, (3, 2560), dtype=jnp.float32)
    out4 = jax.block_until_ready(
        lorenz63_forward(t, state4, sigma, rho, beta, block_rows=16))
    ref4 = _reference(t, state4, sigma_f, rho_f, beta_f)
    assert out4.shape == state4.shape and out4.dtype == jnp.float32
    assert jnp.allclose(out4, ref4, atol=1e-5, rtol=1e-5)

    print("KERNEL_OK")
</pallas_src>

<mosaic_0001>
module attributes {stable_mosaic.version = 11 : i64} {
  func.func @_lorenz63_kernel(%arg0: i32, %arg1: memref<3xf32, #tpu.memory_space<smem>>, %arg2: memref<3x8x128xf32, #tpu.memory_space<vmem>>, %arg3: memref<3x8x128xf32, #tpu.memory_space<vmem>>) attributes {dimension_semantics = [#tpu.dimension_semantics<parallel>], iteration_bounds = array<i64: 1>, scalar_prefetch = 0 : i64, scratch_operands = 0 : i64, tpu.core_type = #tpu.core_type<tc>, window_params = [{transform_indices = @transform_0, window_bounds = array<i64: 3>}, {transform_indices = @transform_1, window_bounds = array<i64: 3, 8, 128>}, {transform_indices = @transform_2, window_bounds = array<i64: 3, 8, 128>}]} {
    %c0 = arith.constant 0 : index
    %0 = memref.load %arg1[%c0] : memref<3xf32, #tpu.memory_space<smem>>
    %c1 = arith.constant 1 : index
    %1 = memref.load %arg1[%c1] : memref<3xf32, #tpu.memory_space<smem>>
    %c2 = arith.constant 2 : index
    %2 = memref.load %arg1[%c2] : memref<3xf32, #tpu.memory_space<smem>>
    %c0_0 = arith.constant 0 : index
    %c0_1 = arith.constant 0 : index
    %c0_2 = arith.constant 0 : index
    %3 = vector.load %arg2[%c0_0, %c0_1, %c0_2] : memref<3x8x128xf32, #tpu.memory_space<vmem>>, vector<1x8x128xf32>
    %4 = vector.shape_cast %3 : vector<1x8x128xf32> to vector<8x128xf32>
    %c1_3 = arith.constant 1 : index
    %c0_4 = arith.constant 0 : index
    %c0_5 = arith.constant 0 : index
    %5 = vector.load %arg2[%c1_3, %c0_4, %c0_5] : memref<3x8x128xf32, #tpu.memory_space<vmem>>, vector<1x8x128xf32>
    %6 = vector.shape_cast %5 : vector<1x8x128xf32> to vector<8x128xf32>
    %c2_6 = arith.constant 2 : index
    %c0_7 = arith.constant 0 : index
    %c0_8 = arith.constant 0 : index
    %7 = vector.load %arg2[%c2_6, %c0_7, %c0_8] : memref<3x8x128xf32, #tpu.memory_space<vmem>>, vector<1x8x128xf32>
    %8 = vector.shape_cast %7 : vector<1x8x128xf32> to vector<8x128xf32>
    %9 = arith.subf %6, %4 : vector<8x128xf32>
    %10 = vector.broadcast %0 : f32 to vector<8x128xf32>
    %11 = arith.mulf %10, %9 : vector<8x128xf32>
    %c0_9 = arith.constant 0 : index
    %c0_10 = arith.constant 0 : index
    %c0_11 = arith.constant 0 : index
    %12 = vector.load %arg3[%c0_9, %c0_10, %c0_11] : memref<3x8x128xf32, #tpu.memory_space<vmem>>, vector<1x8x128xf32>
    %13 = vector.shape_cast %12 : vector<1x8x128xf32> to vector<8x128xf32>
    %14 = vector.shape_cast %11 : vector<8x128xf32> to vector<1x8x128xf32>
    tpu.vector_store %arg3[%c0_9, %c0_10, %c0_11], %14 {strides = array<i32>} : memref<3x8x128xf32, #tpu.memory_space<vmem>>, vector<1x8x128xf32>,
    %15 = vector.broadcast %1 : f32 to vector<8x128xf32>
    %16 = arith.subf %15, %8 : vector<8x128xf32>
    %17 = arith.mulf %4, %16 : vector<8x128xf32>
    %18 = arith.subf %17, %6 : vector<8x128xf32>
    %c1_12 = arith.constant 1 : index
    %c0_13 = arith.constant 0 : index
    %c0_14 = arith.constant 0 : index
    %19 = vector.load %arg3[%c1_12, %c0_13, %c0_14] : memref<3x8x128xf32, #tpu.memory_space<vmem>>, vector<1x8x128xf32>
    %20 = vector.shape_cast %19 : vector<1x8x128xf32> to vector<8x128xf32>
    %21 = vector.shape_cast %18 : vector<8x128xf32> to vector<1x8x128xf32>
    tpu.vector_store %arg3[%c1_12, %c0_13, %c0_14], %21 {strides = array<i32>} : memref<3x8x128xf32, #tpu.memory_space<vmem>>, vector<1x8x128xf32>,
    %22 = arith.mulf %4, %6 : vector<8x128xf32>
    %23 = vector.broadcast %2 : f32 to vector<8x128xf32>
    %24 = arith.mulf %23, %8 : vector<8x128xf32>
    %25 = arith.subf %22, %24 : vector<8x128xf32>
    %c2_15 = arith.constant 2 : index
    %c0_16 = arith.constant 0 : index
    %c0_17 = arith.constant 0 : index
    %26 = vector.load %arg3[%c2_15, %c0_16, %c0_17] : memref<3x8x128xf32, #tpu.memory_space<vmem>>, vector<1x8x128xf32>
    %27 = vector.shape_cast %26 : vector<1x8x128xf32> to vector<8x128xf32>
    %28 = vector.shape_cast %25 : vector<8x128xf32> to vector<1x8x128xf32>
    tpu.vector_store %arg3[%c2_15, %c0_16, %c0_17], %28 {strides = array<i32>} : memref<3x8x128xf32, #tpu.memory_space<vmem>>, vector<1x8x128xf32>,
    return
  }
  func.func @transform_0(%arg0: i32) -> i32 {
    %c0_i32 = arith.constant 0 : i32
    %c0_i32_0 = arith.constant 0 : i32
    return %c0_i32 : i32
  }
  func.func @transform_1(%arg0: i32) -> (i32, i32, i32) {
    %c0_i32 = arith.constant 0 : i32
    %c0_i32_0 = arith.constant 0 : i32
    %c0_i32_1 = arith.constant 0 : i32
    return %c0_i32, %arg0, %c0_i32_0 : i32, i32, i32
  }
  func.func @transform_2(%arg0: i32) -> (i32, i32, i32) {
    %c0_i32 = arith.constant 0 : i32
    %c0_i32_0 = arith.constant 0 : i32
    %c0_i32_1 = arith.constant 0 : i32
    return %c0_i32, %arg0, %c0_i32_0 : i32, i32, i32
  }
}

</mosaic_0001>

<bundles_post_ra>
// kernel: tpu_custom_call.1
= control target key start
LH: loop header
LB: loop body
LE: loop exit
PB: predicated region body
PF: predicated region fallthrough
CT: control target
= control target key end

     0   :  { %7 = vsyncpa [#allocation5], 0  ;;  %s175_s0 = inlined_call_operand.hbm [shape: f32[3], index: 0, kind: input, shape index: {}]   ;;  %s176_s1 = inlined_call_operand.hbm [shape: f32[3,8,128], index: 1, kind: input, shape index: {}]   ;;  %s177_s2 = inlined_call_operand.hbm [shape: f32[3,8,128], index: 2, kind: output, shape index: {}]  }
   0x1   :  { %8 = vsyncpa [#allocation3], 0 }
   0x2   :  { %9 = vsyncpa [#allocation4], 0  ;;  %s140_s9 = smov [#allocation2]   ;;  %s141_s12 = smov [#allocation6]  }
   0x3   :  { %17 = dma.hbm_to_smem %s175_s0, 16, %s140_s9, [#allocation5]  }
   0x4   :  { %s23_s13 = sshll.u32 %s141_s12, 4  ;;  %s24_s13 = int_to_ptr.vmem [resolvable:$true] %s23_s13 }
   0x5   :  { %s102_s14 = scalar_lea.vmem %s24_s13, 384  ;;  %p107_p1 = scmp.lt.s32.totalorder %s24_s13, %s24_s13 }
   0x6   :  { %p103_p0 = scmp.ne.s32.totalorder %s24_s13, %s102_s14  ;;  %p108_p2 = scmp.lt.s32.totalorder %s102_s14, %s102_s14 }
   0x8   :  { %p109_p3 = por %p108_p2, %p107_p1 }
   0xa   :  { %p110_p4 = pnand %p109_p3, %p103_p0 }
   0xc   :  { %113 = shalt.err (!%p110_p4)
}
   0xd   :  { %s142_s15 = smov 128   ;;  %s143_s16 = smov 8  }
   0xe   :  { %29 = dma.hbm_to_vmem [thread:$0]  %s176_s1, 384, %s24_s13, [#allocation3], %s142_s15, %s142_s15, %s143_s16  }
   0xf   :  { %134 = dma.done.wait [#allocation5], 16  }
  0x10   :  { %135 = vsyncadd [#allocation5], 4294967280 }
  0x11   :  { %136 = dma.done.wait [#allocation3], 384  }
  0x12   :  { %137 = vsyncadd [#allocation3], 4294966912 }
  0x13   :  { %36 = sfence }
  0x14   :  { %s37_s0 = sld [smem:[#allocation2]]  ;;  %v40_v0 = vld [vmem:[#allocation6] sm:$0xff]  ;;  %v42_v1 = vld [vmem:[#allocation6 + $0x8] sm:$0xff]  ;;  %v44_v3 = vld [vmem:[#allocation6 + $0x10] sm:$0xff]  ;;  %s144_s1 = smov [#allocation7]  }
  0x15   :  { %s79_s19 = sld [smem:[#allocation2 + $0x1]]  ;;  %v45_v2 = vsub.f32 %v42_v1, %v40_v0  ;;  %v55_v7 = vmul.f32 %v42_v1, %v40_v0  ;;  %s66_s21 = sshll.u32 %s144_s1, 4  ;;  %s67_s21 = int_to_ptr.vmem [resolvable:$true] %s66_s21 }
  0x16   :  { %s80_s20 = sld [smem:[#allocation2 + $0x2]]  ;;  %s114_s22 = scalar_lea.vmem %s67_s21, 384 }
  0x17   :  { %p115_p5 = scmp.ne.s32.totalorder %s67_s21, %s114_s22  ;;  %p119_p6 = scmp.lt.s32.totalorder %s67_s21, %s67_s21 }
  0x18   :  { %p120_p7 = scmp.lt.s32.totalorder %s114_s22, %s114_s22 }
  0x1a   :  { %v46_v4 = vstv %s37_s0  ;;  %p121_p8 = por %p120_p7, %p119_p6 }
  0x1b   :  { %v47_v5 = vmul.f32 %v46_v4, %v45_v2  ;;  %v49_v6 = vstv %s79_s19 }
  0x1c   :  { %v50_v8 = vsub.f32 %v49_v6, %v44_v3  ;;  %v56_v9 = vstv %s80_s20  ;;  %p122_p9 = pnand %p121_p8, %p115_p5 }
  0x1d   :  { %48 = vst [vmem:[#allocation7] sm:$0xff] %v47_v5  ;;  %v57_v10 = vmul.f32 %v56_v9, %v44_v3 }
  0x1e   :  { %v51_v11 = vmul.f32 %v50_v8, %v40_v0 }
  0x1f   :  { %v58_v12 = vsub.f32 %v55_v7, %v57_v10 }
  0x20   :  { %v52_v13 = vsub.f32 %v51_v11, %v42_v1 }
  0x21   :  { %60 = vst [vmem:[#allocation7 + $0x10] sm:$0xff] %v58_v12 }
  0x22   :  { %54 = vst [vmem:[#allocation7 + $0x8] sm:$0xff] %v52_v13 }
  0x23   :  { %125 = shalt.err (!%p122_p9)
}
  0x24   :  { %72 = dma.vmem_to_hbm [thread:$0]  %s67_s21, 384, %s177_s2, [#allocation4], %s142_s15, %s142_s15, %s143_s16  }
  0x25   :  { %138 = dma.done.wait [#allocation4], 384  }
  0x26   :  { %139 = vsyncadd [#allocation4], 4294966912 }
  0x27   :  { %76 = vsyncpa [#allocation3], 1 }
  0x28   :  { %77 = vsyncpa [#allocation4], 1 }
  0x29   :  { %78 = vsyncpa [#allocation5], 1 }

</bundles_post_ra>
